<compile_context>
chip_gen: v6e
topology: v6e:2x2x1
jax: 0.10.0
libtpu: 0.0.40
codegen_flags: <defaults>
</compile_context>

<pallas_src>
import jax
import jax.numpy as jnp
from jax.experimental import pallas as pl
from jax.experimental.pallas import tpu as pltpu

_TARGET_TILE_BYTES = 4 * 1024 * 1024   # ~4 MiB per f32 operand per grid step


def _residual_alpha_kernel(alpha_ref, x_ref, hh_ref, o_ref):
    # alpha_ref: (1,) fp32 scalar-prefetch ref in SMEM (read once per step).
    # x_ref / hh_ref / o_ref: lane-dense VMEM tiles.
    alpha = alpha_ref[0]
    x = x_ref[...].astype(jnp.float32)
    hh = hh_ref[...].astype(jnp.float32)
    # One VPU FMA per vreg; HBM streaming dominates, so f32 math is hidden and
    # stays correct on v5e (no bf16 VPU).
    # TODO(synk): optional native-bf16 math path for v6e/v7x (minor, non-binding win).
    o_ref[...] = (x + alpha * hh).astype(o_ref.dtype)


def _choose_layout(total):
    """Pick a lane-dense (rows, cols) view + row tile with NO padding."""
    cols = None
    for c in (2048, 1024, 512, 256, 128):   # prefer the widest lane-dense slab
        if total % c == 0:
            cols = c
            break
    if cols is None:
        return None                          # caller falls back to fused XLA path
    rows = total // cols
    # ~4 MiB per operand per step -> 3 operands x 2 pipeline buffers <= 24 MiB.
    row_tile = max(8, _TARGET_TILE_BYTES // (cols * 4))
    # Keep >= 2 grid steps when the tensor allows it so the "parallel" axis can
    # actually shard across both v7x TensorCores (no-op on single-TC v5e/v6e).
    while row_tile > 8 and -(-rows // row_tile) < 2:
        row_tile //= 2                        # stays a multiple of 8
    row_tile = min(row_tile, rows)            # tiny tensors: one full-extent block
    n_tiles = -(-rows // row_tile)            # partial edge block is fine (masked)
    return rows, cols, row_tile, n_tiles


def residual_with_learned_alpha(x, hh_up, alpha):
    """out = x + alpha * hh_up.  x, hh_up: same shape; alpha: (1,) or scalar."""
    assert x.shape == hh_up.shape, "x and HH_up must have the same shape"
    alpha = jnp.asarray(alpha, jnp.float32).reshape(-1)
    assert alpha.shape == (1,), "alpha must be a single learned scalar"

    orig_shape = x.shape
    total = x.size
    layout = _choose_layout(total)
    if layout is None:
        # Element count not 128-divisible: a standalone Pallas call buys nothing
        # here; let XLA fuse the elementwise FMA in a single pass.
        out = x.astype(jnp.float32) + alpha[0] * hh_up.astype(jnp.float32)
        return out.astype(x.dtype)

    rows, cols, row_tile, n_tiles = layout

    # Contiguous reshape to a lane-dense 2-D slab: free (no copy, no padding).
    x2 = x.reshape(rows, cols)
    hh2 = hh_up.reshape(rows, cols)

    # index_map receives the scalar-prefetch ref as a trailing positional arg.
    tile_spec = pl.BlockSpec((row_tile, cols), lambda i, alpha_ref: (i, 0))

    out2 = pl.pallas_call(
        _residual_alpha_kernel,
        out_shape=jax.ShapeDtypeStruct((rows, cols), x.dtype),
        grid_spec=pltpu.PrefetchScalarGridSpec(
            num_scalar_prefetch=1,        # alpha lands in SMEM once, no per-step DMA
            grid=(n_tiles,),
            in_specs=[tile_spec, tile_spec],
            out_specs=tile_spec,
        ),
        compiler_params=pltpu.CompilerParams(
            # Independent output tiles -> shard the grid across TensorCores (v7x).
            dimension_semantics=("parallel",),
            # 3 operands x 2 buffers x <=4 MiB = <=24 MiB resident; 32 MiB leaves
            # headroom and fits v5e/v6e defaults and v7x's 64 MiB physical VMEM.
            vmem_limit_bytes=32 * 1024 * 1024,
        ),
    )(alpha, x2, hh2)

    return out2.reshape(orig_shape)


if __name__ == "__main__":
    key = jax.random.PRNGKey(0)
    kx, kh = jax.random.split(key)

    N, C, H, W = 2, 4, 16, 16
    x = jax.random.normal(kx, (N, C, H, W), dtype=jnp.float32)
    hh_up = jax.random.normal(kh, (N, C, H, W), dtype=jnp.float32)

    # nn.Parameter(th.ones(1) * 0.5) -> deterministic init
    alpha = jnp.ones((1,), dtype=jnp.float32) * 0.5

    out = residual_with_learned_alpha(x, hh_up, alpha)
    out = jax.block_until_ready(out)

    # correctness check against the obvious reference
    ref = x + alpha[0] * hh_up
    assert out.shape == x.shape and out.dtype == x.dtype
    assert jnp.allclose(out, ref, atol=1e-6, rtol=1e-6), "mismatch vs reference"

    print("KERNEL_OK")
</pallas_src>

<mosaic_0001>
module attributes {stable_mosaic.version = 11 : i64} {
  func.func @_residual_alpha_kernel(%arg0: i32, %arg1: memref<1xf32, #tpu.memory_space<smem>>, %arg2: memref<1x2048xf32, #tpu.memory_space<vmem>>, %arg3: memref<1x2048xf32, #tpu.memory_space<vmem>>, %arg4: memref<1x2048xf32, #tpu.memory_space<vmem>>) attributes {dimension_semantics = [#tpu.dimension_semantics<parallel>], iteration_bounds = array<i64: 1>, scalar_prefetch = 1 : i64, scratch_operands = 0 : i64, tpu.core_type = #tpu.core_type<tc>, window_params = [{transform_indices = @transform_0, window_bounds = array<i64: 1, 2048>}, {transform_indices = @transform_1, window_bounds = array<i64: 1, 2048>}, {transform_indices = @transform_2, window_bounds = array<i64: 1, 2048>}]} {
    %c0 = arith.constant 0 : index
    %0 = memref.load %arg1[%c0] : memref<1xf32, #tpu.memory_space<smem>>
    %c0_0 = arith.constant 0 : index
    %c0_1 = arith.constant 0 : index
    %1 = vector.load %arg2[%c0_0, %c0_1] : memref<1x2048xf32, #tpu.memory_space<vmem>>, vector<1x2048xf32>
    %c0_2 = arith.constant 0 : index
    %c0_3 = arith.constant 0 : index
    %2 = vector.load %arg3[%c0_2, %c0_3] : memref<1x2048xf32, #tpu.memory_space<vmem>>, vector<1x2048xf32>
    %3 = vector.broadcast %0 : f32 to vector<1x2048xf32>
    %4 = arith.mulf %3, %2 : vector<1x2048xf32>
    %5 = arith.addf %1, %4 : vector<1x2048xf32>
    %c0_4 = arith.constant 0 : index
    %c0_5 = arith.constant 0 : index
    %6 = vector.load %arg4[%c0_4, %c0_5] : memref<1x2048xf32, #tpu.memory_space<vmem>>, vector<1x2048xf32>
    tpu.vector_store %arg4[%c0_4, %c0_5], %5 {strides = array<i32>} : memref<1x2048xf32, #tpu.memory_space<vmem>>, vector<1x2048xf32>,
    return
  }
  func.func @transform_0(%arg0: i32, %arg1: memref<1xf32, #tpu.memory_space<smem>>) -> (i32, i32) {
    %c0_i32 = arith.constant 0 : i32
    %c0_i32_0 = arith.constant 0 : i32
    return %arg0, %c0_i32 : i32, i32
  }
  func.func @transform_1(%arg0: i32, %arg1: memref<1xf32, #tpu.memory_space<smem>>) -> (i32, i32) {
    %c0_i32 = arith.constant 0 : i32
    %c0_i32_0 = arith.constant 0 : i32
    return %arg0, %c0_i32 : i32, i32
  }
  func.func @transform_2(%arg0: i32, %arg1: memref<1xf32, #tpu.memory_space<smem>>) -> (i32, i32) {
    %c0_i32 = arith.constant 0 : i32
    %c0_i32_0 = arith.constant 0 : i32
    return %arg0, %c0_i32 : i32, i32
  }
}

</mosaic_0001>

<bundles_post_ra>
// kernel: tpu_custom_call.1
= control target key start
LH: loop header
LB: loop body
LE: loop exit
PB: predicated region body
PF: predicated region fallthrough
CT: control target
= control target key end

     0   :  { %9 = vsyncpa [#allocation5], 0  ;;  %s170_s0 = inlined_call_operand.<no memory space> [shape: f32[1], index: 0, kind: input, shape index: {}]   ;;  %s171_s1 = inlined_call_operand.hbm [shape: f32[1,2048], index: 1, kind: input, shape index: {}]   ;;  %s172_s2 = inlined_call_operand.hbm [shape: f32[1,2048], index: 2, kind: input, shape index: {}]   ;;  %s173_s3 = inlined_call_operand.hbm [shape: f32[1,2048], index: 3, kind: output, shape index: {}]  }
   0x1   :  { %10 = vsyncpa [#allocation8], 0 }
   0x2   :  { %11 = vsyncpa [#allocation6], 0  ;;  %s135_s12 = smov [#allocation4]   ;;  %s136_s14 = smov [#allocation7]  }
   0x3   :  { %s18_s13 = sshll.u32 %s135_s12, 4  ;;  %s28_s15 = sshll.u32 %s136_s14, 4  ;;  %s19_s13 = int_to_ptr.vmem [resolvable:$true] %s18_s13  ;;  %s29_s15 = int_to_ptr.vmem [resolvable:$true] %s28_s15 }
   0x4   :  { %s77_s16 = scalar_lea.vmem %s19_s13, 256  ;;  %p82_p1 = scmp.lt.s32.totalorder %s19_s13, %s19_s13 }
   0x5   :  { %p78_p0 = scmp.ne.s32.totalorder %s19_s13, %s77_s16  ;;  %p83_p2 = scmp.lt.s32.totalorder %s77_s16, %s77_s16 }
   0x7   :  { %p84_p3 = por %p83_p2, %p82_p1 }
   0x9   :  { %p85_p4 = pnand %p84_p3, %p78_p0 }
   0xb   :  { %88 = shalt.err (!%p85_p4)
}
   0xc   :  { %21 = dma.hbm_to_vmem [thread:$0]  %s171_s1, 256, %s19_s13, [#allocation5]  }
   0xd   :  { %s97_s19 = scalar_lea.vmem %s29_s15, 256  ;;  %p102_p6 = scmp.lt.s32.totalorder %s29_s15, %s29_s15 }
   0xe   :  { %p98_p5 = scmp.ne.s32.totalorder %s29_s15, %s97_s19  ;;  %p103_p7 = scmp.lt.s32.totalorder %s97_s19, %s97_s19 }
  0x10   :  { %p104_p8 = por %p103_p7, %p102_p6 }
  0x12   :  { %p105_p9 = pnand %p104_p8, %p98_p5 }
  0x14   :  { %108 = shalt.err (!%p105_p9)
}
  0x15   :  { %31 = dma.hbm_to_vmem [thread:$0]  %s172_s2, 256, %s29_s15, [#allocation8]  }
  0x16   :  { %129 = dma.done.wait [#allocation5], 256  }
  0x17   :  { %130 = vsyncadd [#allocation5], 4294967040 }
  0x18   :  { %131 = dma.done.wait [#allocation8], 256  }
  0x19   :  { %132 = vsyncadd [#allocation8], 4294967040  ;;  %v43_v0 = vstv %s170_s0  ;;  %v39_v1 = vld [vmem:[#allocation4] sm:$0xff]  ;;  %v41_v2 = vld [vmem:[#allocation7] sm:$0xff]  ;;  %s137_s1 = smov [#allocation9]  }
  0x1a   :  { %v44_v3 = vmul.f32 %v43_v0, %v41_v2  ;;  %v40_v4 = vld [vmem:[#allocation4 + $0x8] sm:$0xff]  ;;  %v42_v5 = vld [vmem:[#allocation7 + $0x8] sm:$0xff]  ;;  %s56_s24 = sshll.u32 %s137_s1, 4  ;;  %s57_s24 = int_to_ptr.vmem [resolvable:$true] %s56_s24 }
  0x1b   :  { %v45_v6 = vmul.f32 %v43_v0, %v42_v5  ;;  %s109_s2 = scalar_lea.vmem %s57_s24, 256  ;;  %p114_p11 = scmp.lt.s32.totalorder %s57_s24, %s57_s24 }
  0x1c   :  { %v46_v7 = vadd.f32 %v44_v3, %v39_v1  ;;  %p110_p10 = scmp.ne.s32.totalorder %s57_s24, %s109_s2  ;;  %p115_p12 = scmp.lt.s32.totalorder %s109_s2, %s109_s2 }
  0x1d   :  { %v47_v8 = vadd.f32 %v45_v6, %v40_v4 }
  0x1e   :  { %48 = vst [vmem:[#allocation9] sm:$0xff] %v46_v7  ;;  %p116_p13 = por %p115_p12, %p114_p11 }
  0x1f   :  { %49 = vst [vmem:[#allocation9 + $0x8] sm:$0xff] %v47_v8 }
  0x20   :  { %p117_p0 = pnand %p116_p13, %p110_p10 }
  0x22   :  { %120 = shalt.err (!%p117_p0)
}
  0x23   :  { %59 = dma.vmem_to_hbm [thread:$0]  %s57_s24, 256, %s173_s3, [#allocation6]  }
  0x24   :  { %133 = dma.done.wait [#allocation6], 256  }
  0x25   :  { %134 = vsyncadd [#allocation6], 4294967040 }
  0x26   :  { %63 = vsyncpa [#allocation5], 1 }
  0x27   :  { %64 = vsyncpa [#allocation8], 1 }
  0x28   :  { %65 = vsyncpa [#allocation6], 1 }

</bundles_post_ra>
